<compile_context>
chip_gen: v7x
topology: tpu7x:2x2x1
jax: 0.10.0
libtpu: 0.0.40
codegen_flags: <defaults>
</compile_context>

<pallas_src>
import jax
import jax.numpy as jnp
from jax.experimental import pallas as pl
from jax.experimental.pallas import tpu as pltpu


def _round_up(x, m):
    return ((x + m - 1) // m) * m


def _block_spec(shape, index_map, *, buffer_count=None):
    """BlockSpec with optional single/multi buffering; degrades gracefully if the
    running jax version does not expose pipeline_mode / pl.Buffered."""
    if buffer_count is not None:
        try:
            return pl.BlockSpec(shape, index_map,
                                pipeline_mode=pl.Buffered(buffer_count))
        except (TypeError, AttributeError):
            pass
    return pl.BlockSpec(shape, index_map)


def timestep_embedding_kernel(t_ref, w1_ref, b1_ref, w2_ref, b2_ref, o_ref):
    # t_ref: (TM, 1) f32 | w1/b1: (1, D_pad) f32 | w2: (D_pad, TN) bf16
    # b2: (1, TN) f32   | o: (TM, TN) out_dtype
    t = t_ref[...]
    # First linear (K=1) as a broadcast mul+add on the VPU, ReLU fused, bf16 cast
    # folded into the expression so only one activation buffer is live.
    h = jnp.maximum(t * w1_ref[...] + b1_ref[...], 0.0).astype(w2_ref.dtype)
    # Second linear on the MXU: bf16 operands, f32 accumulation.
    out = jnp.dot(h, w2_ref[...], preferred_element_type=jnp.float32) + b2_ref[...]
    o_ref[...] = out.astype(o_ref.dtype)


def _pick_tn(d_pad, weight_itemsize):
    """Output-column tile.  Keep w2 fully resident when it comfortably fits VMEM
    (even on v7x's 64 MiB); otherwise bound the per-step w2 block to ~8 MiB."""
    if d_pad * d_pad * weight_itemsize <= (24 << 20):
        return d_pad
    for tn in (1024, 512, 256, 128):
        if d_pad % tn == 0 and d_pad * tn * weight_itemsize <= (8 << 20):
            return tn
    return 128


def prepare_timestep_embedding_params(w1, b1, w2, b2, *, weight_dtype=jnp.bfloat16):
    """Pad/cast the weights ONCE (call at init time, reuse across forward calls).

    w1: (1, D), b1: (D,), w2: (D, D) stored transposed for x @ W, b2: (D,).
    """
    D = w2.shape[0]
    D_pad = _round_up(max(D, 128), 128)
    w1_p = jnp.zeros((1, D_pad), jnp.float32).at[:, :D].set(
        w1.reshape(1, D).astype(jnp.float32))
    b1_p = jnp.zeros((1, D_pad), jnp.float32).at[:, :D].set(
        b1.reshape(1, D).astype(jnp.float32))
    w2_p = jnp.zeros((D_pad, D_pad), weight_dtype).at[:D, :D].set(
        w2.astype(weight_dtype))
    b2_p = jnp.zeros((1, D_pad), jnp.float32).at[:, :D].set(
        b2.reshape(1, D).astype(jnp.float32))
    return dict(dim=D, dim_padded=D_pad, w1=w1_p, b1=b1_p, w2=w2_p, b2=b2_p)


def timestep_embedding(t, params, *, out_dtype=jnp.float32):
    """t: (B,) any numeric dtype. Returns (B, dim) in out_dtype (f32 by default,
    bf16 optionally when the downstream consumer accepts it)."""
    B = t.shape[0]
    D = params["dim"]
    D_pad = params["dim_padded"]
    w1_p, b1_p, w2_p, b2_p = params["w1"], params["b1"], params["w2"], params["b2"]
    w_itemsize = jnp.dtype(w2_p.dtype).itemsize
    out_itemsize = jnp.dtype(out_dtype).itemsize

    # ---- tiling -------------------------------------------------------------
    B8 = _round_up(max(B, 8), 8)
    if D_pad <= 2048:
        tm_cap = 1024
    elif D_pad <= 4096:
        tm_cap = 512
    else:
        tm_cap = 256
    TM = B8 if B8 <= tm_cap else tm_cap
    B_pad = _round_up(B8, TM)

    TN = _pick_tn(D_pad, w_itemsize)
    n_col = D_pad // TN
    n_batch = B_pad // TM
    # Column axis outer, batch axis inner: a w2 column block stays VMEM-resident
    # across all batch tiles.
    grid = (n_col, n_batch)

    # Only the (cheap) timestep vector is padded per call.
    t2 = jnp.zeros((B_pad, 1), jnp.float32).at[:B, 0].set(t.astype(jnp.float32))

    # ---- cost estimate ------------------------------------------------------
    w2_bytes = D_pad * D_pad * w_itemsize
    cost = pl.CostEstimate(
        flops=2 * B_pad * D_pad * D_pad + n_col * 3 * B_pad * D_pad,
        transcendentals=0,
        bytes_accessed=(B_pad * 4 + w2_bytes + 3 * D_pad * 4
                        + B_pad * D_pad * out_itemsize),
    )

    # ---- VMEM budget (per-generation cap, not a fixed 96 MiB) ---------------
    w2_bufs = 1 if n_col == 1 else 2            # constant index_map -> single buffer
    vmem_est = (2 * TM * 4                       # t tile (double-buffered)
                + 2 * TM * TN * out_itemsize     # out tile (double-buffered)
                + w2_bufs * D_pad * TN * w_itemsize
                + 2 * D_pad * 4                  # w1 + b1 (single-buffered)
                + w2_bufs * TN * 4               # b2
                + TM * D_pad * (4 + w_itemsize)  # activation intermediates
                + TM * TN * 4)                   # f32 matmul accumulator
    try:
        vmem_cap = int(pltpu.get_tpu_info().vmem_capacity_bytes)
    except Exception:
        vmem_cap = 64 << 20                      # conservative (v7x) fallback
    compiler_kwargs = dict(dimension_semantics=("parallel", "parallel"))
    if vmem_est > (16 << 20):                    # smallest real default scoped limit (v5e)
        compiler_kwargs["vmem_limit_bytes"] = int(
            min(vmem_est * 1.5, vmem_cap * 3 // 4))

    # ---- specs ---------------------------------------------------------------
    in_specs = [
        _block_spec((TM, 1), lambda j, i: (i, 0)),                         # t
        _block_spec((1, D_pad), lambda j, i: (0, 0), buffer_count=1),      # w1
        _block_spec((1, D_pad), lambda j, i: (0, 0), buffer_count=1),      # b1
        _block_spec((D_pad, TN), lambda j, i: (0, j),
                    buffer_count=1 if n_col == 1 else None),               # w2
        _block_spec((1, TN), lambda j, i: (0, j),
                    buffer_count=1 if n_col == 1 else None),               # b2
    ]
    out_spec = pl.BlockSpec((TM, TN), lambda j, i: (i, j))

    out = pl.pallas_call(
        timestep_embedding_kernel,
        out_shape=jax.ShapeDtypeStruct((B_pad, D_pad), out_dtype),
        grid_spec=pltpu.PrefetchScalarGridSpec(
            num_scalar_prefetch=0,
            grid=grid,
            in_specs=in_specs,
            out_specs=out_spec,
        ),
        compiler_params=pltpu.CompilerParams(**compiler_kwargs),
        cost_estimate=cost,
    )(t2, w1_p, b1_p, w2_p, b2_p)

    return out[:B, :D]


def init_params(key, dim=64):
    """Deterministic init mirroring nn.Linear shapes, stored transposed for x @ W."""
    k1, k2, k3, k4 = jax.random.split(key, 4)
    bound1 = 1.0                                    # fan_in = 1
    w1 = jax.random.uniform(k1, (1, dim), jnp.float32, -bound1, bound1)
    b1 = jax.random.uniform(k2, (dim,), jnp.float32, -bound1, bound1)
    bound2 = 1.0 / jnp.sqrt(dim)
    w2 = jax.random.uniform(k3, (dim, dim), jnp.float32, -bound2, bound2)
    b2 = jax.random.uniform(k4, (dim,), jnp.float32, -bound2, bound2)
    return w1, b1, w2, b2


if __name__ == "__main__":
    dim = 64
    B = 8
    key = jax.random.PRNGKey(0)
    kp, kt = jax.random.split(key)
    w1, b1, w2, b2 = init_params(kp, dim)
    # timesteps: integer-like values, as a diffusion model would pass
    t = jax.random.randint(kt, (B,), 0, 1000).astype(jnp.int32)

    # One-time (init) weight preparation; reused across forward calls.
    params = prepare_timestep_embedding_params(w1, b1, w2, b2)

    out = timestep_embedding(t, params)
    out = jax.block_until_ready(out)
    assert out.shape == (B, dim)
    assert out.dtype == jnp.float32

    # Reference in plain JAX with the same bf16 weight/activation cast (f32 accum),
    # so the comparison is apples-to-apples with the kernel's mixed precision.
    # (Set weight_dtype=jnp.float32 in prepare_timestep_embedding_params for exact
    #  f32 parity with the PyTorch module.)
    t2 = t.astype(jnp.float32)[:, None]
    h_ref = jnp.maximum(t2 * w1 + b1[None, :], 0.0).astype(jnp.bfloat16)
    ref = jnp.dot(h_ref, w2.astype(jnp.bfloat16),
                  preferred_element_type=jnp.float32) + b2[None, :]
    assert jnp.allclose(out, ref, atol=5e-2, rtol=2e-2), float(jnp.max(jnp.abs(out - ref)))

    print("KERNEL_OK")
</pallas_src>

<mosaic_0001>
module attributes {stable_mosaic.version = 11 : i64} {
  func.func @timestep_embedding_kernel(%arg0: i32, %arg1: i32, %arg2: memref<8x1xf32, #tpu.memory_space<vmem>>, %arg3: memref<1x128xf32, #tpu.memory_space<vmem>>, %arg4: memref<1x128xf32, #tpu.memory_space<vmem>>, %arg5: memref<128x128xbf16, #tpu.memory_space<vmem>>, %arg6: memref<1x128xf32, #tpu.memory_space<vmem>>, %arg7: memref<8x128xf32, #tpu.memory_space<vmem>>) attributes {dimension_semantics = [#tpu.dimension_semantics<parallel>, #tpu.dimension_semantics<parallel>], iteration_bounds = array<i64: 1, 1>, scalar_prefetch = 0 : i64, scratch_operands = 0 : i64, tpu.core_type = #tpu.core_type<tc>, window_params = [{transform_indices = @transform_0, window_bounds = array<i64: 8, 1>}, {pipeline_mode = #tpu.pipeline_mode<synchronous>, transform_indices = @transform_1, window_bounds = array<i64: 1, 128>}, {pipeline_mode = #tpu.pipeline_mode<synchronous>, transform_indices = @transform_2, window_bounds = array<i64: 1, 128>}, {pipeline_mode = #tpu.pipeline_mode<synchronous>, transform_indices = @transform_3, window_bounds = array<i64: 128, 128>}, {pipeline_mode = #tpu.pipeline_mode<synchronous>, transform_indices = @transform_4, window_bounds = array<i64: 1, 128>}, {transform_indices = @transform_5, window_bounds = array<i64: 8, 128>}]} {
    %c0 = arith.constant 0 : index
    %c0_0 = arith.constant 0 : index
    %0 = vector.load %arg2[%c0, %c0_0] : memref<8x1xf32, #tpu.memory_space<vmem>>, vector<8x1xf32>
    %c0_1 = arith.constant 0 : index
    %c0_2 = arith.constant 0 : index
    %1 = vector.load %arg3[%c0_1, %c0_2] : memref<1x128xf32, #tpu.memory_space<vmem>>, vector<1x128xf32>
    %2 = vector.broadcast %0 : vector<8x1xf32> to vector<8x128xf32>
    %3 = vector.broadcast %1 : vector<1x128xf32> to vector<8x128xf32>
    %4 = arith.mulf %2, %3 : vector<8x128xf32>
    %c0_3 = arith.constant 0 : index
    %c0_4 = arith.constant 0 : index
    %5 = vector.load %arg4[%c0_3, %c0_4] : memref<1x128xf32, #tpu.memory_space<vmem>>, vector<1x128xf32>
    %6 = vector.broadcast %5 : vector<1x128xf32> to vector<8x128xf32>
    %7 = arith.addf %4, %6 : vector<8x128xf32>
    %cst = arith.constant 0.000000e+00 : f32
    %8 = vector.broadcast %cst : f32 to vector<8x128xf32>
    %9 = arith.maximumf %7, %8 : vector<8x128xf32>
    %10 = arith.truncf %9 : vector<8x128xf32> to vector<8x128xbf16>
    %c0_5 = arith.constant 0 : index
    %c0_6 = arith.constant 0 : index
    %11 = vector.load %arg5[%c0_5, %c0_6] : memref<128x128xbf16, #tpu.memory_space<vmem>>, vector<128x128xbf16>
    %cst_7 = arith.constant dense<0.000000e+00> : vector<8x128xf32>
    %12 = tpu.matmul %10, %11, %cst_7 {dimension_numbers = #tpu.dot_dimension_numbers<[1], [0], [0], [1], [0, 0, 1, 1], [], []>} : vector<8x128xbf16>, vector<128x128xbf16>, vector<8x128xf32> -> vector<8x128xf32>
    %c0_8 = arith.constant 0 : index
    %c0_9 = arith.constant 0 : index
    %13 = vector.load %arg6[%c0_8, %c0_9] : memref<1x128xf32, #tpu.memory_space<vmem>>, vector<1x128xf32>
    %14 = vector.broadcast %13 : vector<1x128xf32> to vector<8x128xf32>
    %15 = arith.addf %12, %14 : vector<8x128xf32>
    %c0_10 = arith.constant 0 : index
    %c0_11 = arith.constant 0 : index
    %16 = vector.load %arg7[%c0_10, %c0_11] : memref<8x128xf32, #tpu.memory_space<vmem>>, vector<8x128xf32>
    tpu.vector_store %arg7[%c0_10, %c0_11], %15 {strides = array<i32>} : memref<8x128xf32, #tpu.memory_space<vmem>>, vector<8x128xf32>,
    return
  }
  func.func @transform_0(%arg0: i32, %arg1: i32) -> (i32, i32) {
    %c0_i32 = arith.constant 0 : i32
    %c0_i32_0 = arith.constant 0 : i32
    return %arg1, %c0_i32 : i32, i32
  }
  func.func @transform_1(%arg0: i32, %arg1: i32) -> (i32, i32) {
    %c0_i32 = arith.constant 0 : i32
    %c0_i32_0 = arith.constant 0 : i32
    %c0_i32_1 = arith.constant 0 : i32
    return %c0_i32, %c0_i32_0 : i32, i32
  }
  func.func @transform_2(%arg0: i32, %arg1: i32) -> (i32, i32) {
    %c0_i32 = arith.constant 0 : i32
    %c0_i32_0 = arith.constant 0 : i32
    %c0_i32_1 = arith.constant 0 : i32
    return %c0_i32, %c0_i32_0 : i32, i32
  }
  func.func @transform_3(%arg0: i32, %arg1: i32) -> (i32, i32) {
    %c0_i32 = arith.constant 0 : i32
    %c0_i32_0 = arith.constant 0 : i32
    return %c0_i32, %arg0 : i32, i32
  }
  func.func @transform_4(%arg0: i32, %arg1: i32) -> (i32, i32) {
    %c0_i32 = arith.constant 0 : i32
    %c0_i32_0 = arith.constant 0 : i32
    return %c0_i32, %arg0 : i32, i32
  }
  func.func @transform_5(%arg0: i32, %arg1: i32) -> (i32, i32) {
    %c0_i32 = arith.constant 0 : i32
    return %arg1, %arg0 : i32, i32
  }
}

</mosaic_0001>

<bundles_post_ra>
// kernel: tpu_custom_call.1
= control target key start
LH: loop header
LB: loop body
LE: loop exit
PB: predicated region body
PF: predicated region fallthrough
CT: control target
= control target key end

     0   :  { %10 = vsyncpa [#allocation3], 0  ;;  %s364_s0 = inlined_call_operand.vmem [shape: f32[8,1], index: 0, kind: input, shape index: {}]   ;;  %s365_s1 = inlined_call_operand.vmem [shape: f32[1,128], index: 1, kind: input, shape index: {}]   ;;  %s366_s2 = inlined_call_operand.vmem [shape: f32[1,128], index: 2, kind: input, shape index: {}]   ;;  %s367_s3 = inlined_call_operand.hbm [shape: bf16[128,128], index: 3, kind: input, shape index: {}]   ;;  %s368_s4 = inlined_call_operand.vmem [shape: f32[1,128], index: 4, kind: input, shape index: {}]   ;;  %s369_s5 = inlined_call_operand.hbm [shape: f32[8,128], index: 5, kind: output, shape index: {}]  }
   0x1   :  { %11 = vsyncpa [#allocation4], 0  ;;  %s291_s18 = smov [#allocation2]   ;;  %s243_s22 = scalar_lea.hbm %s367_s3, 1024 }
   0x2   :  { %s23_s19 = sshll.u32 %s291_s18, 4  ;;  %p244_p0 = scmp.ne.s32.totalorder %s367_s3, %s243_s22  ;;  %s24_s19 = int_to_ptr.vmem [resolvable:$true] %s23_s19 }
   0x3   :  { %p247_p1 = scmp.lt.u32.totalorder %s243_s22, %s367_s3 }
   0x5   :  { %p249_p2 = pnand %p247_p1, %p244_p0 }
   0x7   :  { %252 = shalt.err (!%p249_p2)
}
   0x8   :  { %s253_s27 = scalar_lea.vmem %s24_s19, 1024  ;;  %p258_p4 = scmp.lt.s32.totalorder %s24_s19, %s24_s19 }
   0x9   :  { %p254_p3 = scmp.ne.s32.totalorder %s24_s19, %s253_s27  ;;  %p259_p5 = scmp.lt.s32.totalorder %s253_s27, %s253_s27 }
   0xb   :  { %p260_p6 = por %p259_p5, %p258_p4 }
   0xd   :  { %p261_p7 = pnand %p260_p6, %p254_p3 }
   0xf   :  { %264 = shalt.err (!%p261_p7)
}
  0x10   :  { %s292_s28 = smov 64   ;;  %s293_s29 = smov 4  }
  0x11   :  { %29 = dma.hbm_to_vmem [thread:$0]  %s367_s3, 1024, %s24_s19, [#allocation3], %s292_s28, %s292_s28, %s293_s29  }
  0x12   :  { %287 = dma.done.wait [#allocation3], 1024  }
  0x13   :  { %288 = vsyncadd [#allocation3], 4294966272  ;;  %v294_v0 = vmov 0   ;;  %v295_v1 = vmov 0.0   ;;  %v36_v2 = vld [vmem:[%s364_s0] sm:$0xff]  ;;  %v236_v4 = vld [vmem:[#allocation2 + $0x8] sm:$0xff]  }
  0x14   :  { %234 = vset.pattern.permute.xlu0 %v294_v0  ;;  %207 = vmatprep.subr.bf16.mxu0 %v295_v1  ;;  %v235_v3 = vld [vmem:[#allocation2] sm:$0xff]   ;;  %v237_v5 = vld [vmem:[#allocation2 + $0x10] sm:$0xff]   ;;  %vm296_vm0 = vmmov 0   ;;  %v238_v6 = vld [vmem:[#allocation2 + $0x18] sm:$0xff]   ;;  %s297_s13 = smov [#allocation5]  }
  0x15   :  { %40 = vperm.xlu0 %234, %v36_v2   ;;  %208 = vmatpush3.bf16.msra.mxu0 %v235_v3  ;;  %v239_v7 = vld [vmem:[#allocation2 + $0x20] sm:$0xff]   ;;  %v240_v8 = vld [vmem:[#allocation2 + $0x28] sm:$0xff]   ;;  %v241_v9 = vld [vmem:[#allocation2 + $0x30] sm:$0xff]   ;;  %s178_s14 = sshll.u32 %s297_s13, 4  ;;  %s179_s14 = int_to_ptr.vmem [resolvable:$true] %s178_s14 }
  0x16   :  { %209 = vmatprep.subr.bf16.mxu0 %v295_v1  ;;  %223 = vmatprep.mubr.msk.bf16.mxu0 %vm296_vm0, %v295_v1  ;;  %v242_v10 = vld [vmem:[#allocation2 + $0x38] sm:$0xff]   ;;  %v187_v11 = vld [vmem:[%s365_s1] ss:$0 sm:$0xff]  ;;  %s265_s1 = scalar_lea.vmem %s179_s14, 128  ;;  %p270_p9 = scmp.lt.s32.totalorder %s179_s14, %s179_s14 }
  0x17   :  { %v188_v12 = vld [vmem:[%s366_s2] ss:$0 sm:$0xff]  ;;  %p266_p8 = scmp.ne.s32.totalorder %s179_s14, %s265_s1  ;;  %p271_p10 = scmp.lt.s32.totalorder %s265_s1, %s265_s1 }
  0x18   :  { %v189_v18 = vld [vmem:[%s368_s4] ss:$0 sm:$0xff] }
  0x19   :  { %210 = vmatpush3.bf16.msra.mxu0 %v236_v4  ;;  %p272_p11 = por %p271_p10, %p270_p9 }
  0x1a   :  { %211 = vmatprep.subr.bf16.mxu0 %v295_v1 }
  0x1b   :  { %p273_p12 = pnand %p272_p11, %p266_p8 }
  0x1d   :  { %212 = vmatpush3.bf16.msra.mxu0 %v237_v5 }
  0x1e   :  { %213 = vmatprep.subr.bf16.mxu0 %v295_v1 }
  0x21   :  { %214 = vmatpush3.bf16.msra.mxu0 %v238_v6 }
  0x22   :  { %215 = vmatprep.subr.bf16.mxu0 %v295_v1 }
  0x25   :  { %216 = vmatpush3.bf16.msra.mxu0 %v239_v7 }
  0x26   :  { %217 = vmatprep.subr.bf16.mxu0 %v295_v1 }
  0x29   :  { %218 = vmatpush3.bf16.msra.mxu0 %v240_v8 }
  0x2a   :  { %219 = vmatprep.subr.bf16.mxu0 %v295_v1 }
  0x2d   :  { %220 = vmatpush3.bf16.msra.mxu0 %v241_v9 }
  0x2e   :  { %221 = vmatprep.subr.bf16.mxu0 %v295_v1 }
  0x31   :  { %222 = vmatpush3.bf16.msra.mxu0 %v242_v10 }
  0x94   :  { %v41_v13 = vpop.permute.xlu0 %40 }
  0x95   :  { %v49_v14 = vmul.f32 %v187_v11, %v41_v13 }
  0x97   :  { %v57_v15 = vadd.f32 %v188_v12, %v49_v14 }
  0x99   :  { %v58_v16 = vmax.f32 %v57_v15, 0.0 }
  0x9b   :  { %v59_v17 = vpack.c.bf16 %v58_v16, %v58_v16 }
  0x9d   :  { %224 = vmatmul.mubr.bf16.vlgmr.msra.gmra.mrb[0].mxu0 %v59_v17 }
 0x170   :  { %v165_v19 = vpop.f32.mrb[0].mxu0 }
 0x171   :  { %v166_v20 = vadd.f32 %v189_v18, %v165_v19  ;;  %v225_v21 = vpop.f32.mrb[1].mxu0 }
 0x172   :  { %v168_v22 = vpop.f32.mrb[2].mxu0 }
 0x173   :  { %171 = vst [vmem:[#allocation5] sm:$0xff] %v166_v20  ;;  %v226_v23 = vpop.f32.mrb[3].mxu0 }
 0x174   :  { %276 = shalt.err (!%p273_p12)
}
 0x175   :  { %s277_s4 = scalar_lea.hbm %s369_s5, 128 }
 0x176   :  { %p278_p13 = scmp.ne.s32.totalorder %s369_s5, %s277_s4  ;;  %p281_p0 = scmp.lt.u32.totalorder %s277_s4, %s369_s5 }
 0x178   :  { %p283_p1 = pnand %p281_p0, %p278_p13 }
 0x17a   :  { %286 = shalt.err (!%p283_p1)
}
 0x17b   :  { %181 = dma.vmem_to_hbm [thread:$0]  %s179_s14, 128, %s369_s5, [#allocation4]  }
 0x17c   :  { %289 = dma.done.wait [#allocation4], 128  }
 0x17d   :  { %290 = vsyncadd [#allocation4], 4294967168 }
 0x17e   :  { %185 = vsyncpa [#allocation3], 1 }
 0x17f   :  { %186 = vsyncpa [#allocation4], 1 }

</bundles_post_ra>
